<compile_context>
chip_gen: v6e
topology: v6e:2x2x1
jax: 0.10.0
libtpu: 0.0.40
codegen_flags: <defaults>
</compile_context>

<pallas_src>
import functools

import jax
import jax.numpy as jnp
from jax import lax
from jax.experimental import pallas as pl
from jax.experimental.pallas import tpu as pltpu

NEG = jnp.float32(-1e30)


def _round_up(x, m):
    return (x + m - 1) // m * m


def _const_spec(block_shape, index_map):
    """BlockSpec for a grid-invariant operand; single-buffer it if supported."""
    buffered = getattr(pl, "Buffered", None)
    if buffered is not None:
        try:
            return pl.BlockSpec(block_shape, index_map,
                                pipeline_mode=buffered(1))
        except Exception:  # older BlockSpec signature / Buffered constraints
            pass
    return pl.BlockSpec(block_shape, index_map)


def _vmem_limit_bytes():
    try:
        cap = int(pltpu.get_tpu_info().vmem_capacity_bytes)
    except Exception:
        cap = 64 * 1024 * 1024  # be conservative: assume v7x-sized VMEM
    # ~60% of physical VMEM: ~38 MiB on v7x (64 MiB), ~76 MiB on v5e/v6e.
    return max(32 * 1024 * 1024, min(int(cap * 0.6), 96 * 1024 * 1024))


def intent_decoder_kernel(ht_ref,      # (TB, H)        bf16
                          x_ref,       # (TB*T_p, 2H)   bf16   flattened lstm_out block
                          bias_ref,    # (TB, T_p, 1)   f32    0 / -1e30 length mask
                          waT_ref,     # (H, H)         bf16   Wa^T
                          uaT_ref,     # (2H, H)        bf16   Ua^T
                          va_ref,      # (1, 1, H)      f32    Va
                          wdecT_ref,   # (2H, V_p)      bf16   decoder.weight^T (padded)
                          bdec_ref,    # (1, V_p)       f32    decoder.bias (padded -1e30)
                          out_ref):    # (TB, V_p)      f32    log-probs
    TB = ht_ref.shape[0]
    T_p = bias_ref.shape[1]
    R = x_ref.shape[0]                 # == TB * T_p
    H = ht_ref.shape[1]

    x = x_ref[...]                                             # (R, 2H) bf16

    # c1 = Wa @ ht  (bf16 MXU, f32 accumulate)
    c1 = jnp.dot(ht_ref[...], waT_ref[...],
                 preferred_element_type=jnp.float32)           # (TB, H)

    # c2 = Ua * hiddens  (1x1 conv over channels == channel matmul on the MXU)
    c2 = jnp.dot(x, uaT_ref[...],
                 preferred_element_type=jnp.float32)           # (R, H)

    # c3 + c2 -> tanh : broadcast c1 over the T_p time rows of each batch
    # element with a sublane-broadcast add (no one-hot matmul).
    c4 = jnp.tanh(c2.reshape(TB, T_p, H) + c1[:, None, :])     # (TB, T_p, H)

    # e = Va * c4 : single output channel -> f32 VPU multiply + lane reduce.
    e = jnp.sum(c4 * va_ref[...], axis=-1, keepdims=True)      # (TB, T_p, 1)
    e = e + bias_ref[...]                                      # mask t >= lens[b]

    # Softmax over time (f32; masked positions underflow to exactly 0).
    m = jnp.max(e, axis=1, keepdims=True)                      # (TB, 1, 1)
    p = jnp.exp(e - m)                                         # (TB, T_p, 1)
    s = jnp.sum(p, axis=1, keepdims=True)                      # (TB, 1, 1)
    a = p * pl.reciprocal(s, approx=True)                      # (TB, T_p, 1)

    # sent[b] = sum_t a[b, t] * lstm_out[b, t, :]
    # Fold the (bf16) attention weights into the bf16 lstm_out block and do
    # the per-batch segment sum as one bf16 MXU matmul against an in-kernel
    # generated 0/1 segment matrix (exact in bf16, nothing streamed from HBM).
    a_col = a.reshape(R, 1).astype(jnp.bfloat16)               # (R, 1)
    xw = x * a_col                                             # (R, 2H) bf16
    row = lax.broadcasted_iota(jnp.int32, (TB, R), 0)
    col = lax.broadcasted_iota(jnp.int32, (TB, R), 1)
    lo = row * T_p
    seg = jnp.where((col >= lo) & (col < lo + T_p), 1.0, 0.0)  # (TB, R) 0/1
    sent = jnp.dot(seg.astype(jnp.bfloat16), xw,
                   preferred_element_type=jnp.float32)         # (TB, 2H) f32

    # Decoder linear + log_softmax over the (padded) vocab lanes.
    logits = jnp.dot(sent.astype(jnp.bfloat16), wdecT_ref[...],
                     preferred_element_type=jnp.float32) + bdec_ref[...]
    z = logits - jnp.max(logits, axis=-1, keepdims=True)
    out_ref[...] = z - jnp.log(jnp.sum(jnp.exp(z), axis=-1, keepdims=True))


@functools.partial(jax.jit, static_argnames=("batch_block",))
def intent_decoder_forward(ht, lstm_out, lens, Wa, Ua, Va, Wdec, bdec,
                           *, batch_block=32):
    """ht: (B, H); lstm_out: (B, T, 2H); lens: (B,) int; weights as in nn.Module."""
    B, T, H2 = lstm_out.shape
    H = ht.shape[1]
    V = Wdec.shape[0]
    assert H2 == 2 * H

    f32, bf16 = jnp.float32, jnp.bfloat16

    # Batch block: multiple of 8 (>=16 preferred for bf16 sublane packing),
    # clipped for tiny batches, split so the grid keeps >=2 steps when the
    # padded batch allows it (v7x dual TensorCore sharding via "parallel").
    TB = max(8, (min(batch_block, _round_up(B, 8)) // 8) * 8)
    B_p = _round_up(B, TB)
    if B_p // TB < 2 and TB >= 16 and (TB // 2) % 8 == 0:
        TB //= 2
        B_p = _round_up(B, TB)
    T_p = _round_up(T, 8)
    V_p = _round_up(V, 128)
    R = TB * T_p

    # ---- host-side layout plumbing (padding, transposes, bf16 casts) ----
    ht_p = jnp.zeros((B_p, H), bf16).at[:B].set(ht.astype(bf16))
    x_p = jnp.zeros((B_p, T_p, H2), bf16).at[:B, :T].set(lstm_out.astype(bf16))
    x_flat = x_p.reshape(B_p * T_p, H2)

    # Padded batch rows get a full-length mask so their (discarded) rows stay
    # finite.  NOTE: a *real* row with lens==0 would be NaN in the reference;
    # here it yields uniform attention instead (degenerate case either way).
    lens_p = jnp.concatenate(
        [lens.astype(jnp.int32), jnp.full((B_p - B,), T_p, jnp.int32)])
    valid = jnp.arange(T_p)[None, :] < lens_p[:, None]                # (B_p, T_p)
    attn_bias = jnp.where(valid, 0.0, NEG).astype(f32)[:, :, None]    # (B_p, T_p, 1)

    waT = Wa.T.astype(bf16)                                           # (H, H)
    uaT = Ua.T.astype(bf16)                                           # (2H, H)
    va3 = Va.reshape(1, 1, H).astype(f32)                             # (1, 1, H)
    wdecT = jnp.zeros((H2, V_p), bf16).at[:, :V].set(Wdec.T.astype(bf16))
    bdec_p = jnp.full((1, V_p), NEG, f32).at[0, :V].set(bdec.astype(f32))

    grid = (B_p // TB,)

    grid_spec = pltpu.PrefetchScalarGridSpec(
        num_scalar_prefetch=0,
        grid=grid,
        in_specs=[
            pl.BlockSpec((TB, H), lambda b: (b, 0)),            # ht (bf16)
            pl.BlockSpec((R, H2), lambda b: (b, 0)),            # lstm_out (flattened)
            pl.BlockSpec((TB, T_p, 1), lambda b: (b, 0, 0)),    # length-mask bias
            _const_spec((H, H), lambda b: (0, 0)),              # Wa^T
            _const_spec((H2, H), lambda b: (0, 0)),             # Ua^T
            _const_spec((1, 1, H), lambda b: (0, 0, 0)),        # Va
            _const_spec((H2, V_p), lambda b: (0, 0)),           # decoder W^T (padded)
            _const_spec((1, V_p), lambda b: (0, 0)),            # decoder bias (padded)
        ],
        out_specs=pl.BlockSpec((TB, V_p), lambda b: (b, 0)),
    )

    flops = (2 * B_p * H * H                   # Wa
             + 2 * B_p * T_p * H2 * H          # Ua 1x1 conv
             + 2 * B_p * T_p * H               # Va reduce
             + B_p * T_p * H2                  # a * x fold
             + 2 * B_p * TB * T_p * H2         # segment-sum matmul (incl. T_p)
             + 2 * B_p * H2 * V_p)             # decoder
    trans = B_p * T_p * H + 2 * B_p * T_p + 2 * B_p * V_p
    bytes_accessed = (2 * B_p * T_p * H2                     # lstm_out bf16
                      + 2 * B_p * H                          # ht bf16
                      + 4 * B_p * T_p                        # attention bias
                      + 2 * (H * H + H2 * H + H2 * V_p)      # bf16 weights
                      + 4 * (H + V_p)                        # Va, decoder bias
                      + 4 * B_p * V_p)                       # f32 output
    cost = pl.CostEstimate(flops=flops, transcendentals=trans,
                           bytes_accessed=bytes_accessed)

    out_p = pl.pallas_call(
        intent_decoder_kernel,
        out_shape=jax.ShapeDtypeStruct((B_p, V_p), f32),
        grid_spec=grid_spec,
        compiler_params=pltpu.CompilerParams(
            dimension_semantics=("parallel",),
            vmem_limit_bytes=_vmem_limit_bytes()),
        cost_estimate=cost,
    )(ht_p, x_flat, attn_bias, waT, uaT, va3, wdecT, bdec_p)

    return out_p[:B, :V]


def reference_forward(ht, lstm_out, lens, Wa, Ua, Va, Wdec, bdec):
    B, T, _ = lstm_out.shape
    c1 = ht @ Wa.T                                   # (B, H)
    c2 = jnp.einsum('btc,hc->bth', lstm_out, Ua)     # (B, T, H)
    c4 = jnp.tanh(c1[:, None, :] + c2)
    e = jnp.einsum('bth,h->bt', c4, Va)              # (B, T)
    mask = jnp.arange(T)[None, :] < lens[:, None]
    e = jnp.where(mask, e, -jnp.inf)
    a = jax.nn.softmax(e, axis=1)
    sent = jnp.einsum('bt,btc->bc', a, lstm_out)     # (B, 2H)
    logits = sent @ Wdec.T + bdec
    return jax.nn.log_softmax(logits, axis=1)


if __name__ == "__main__":
    B, T, H, V = 2, 8, 32, 16
    num_layers = 1

    key = jax.random.PRNGKey(0)
    k_h, k_x, k_wa, k_ua, k_va, k_wd, k_bd = jax.random.split(key, 7)

    # LSTM hidden/cell state tuple (h, c); ht = hc[0][-1] (dropout == identity in eval)
    h_state = jax.random.normal(k_h, (num_layers, B, H), jnp.float32)
    c_state = jnp.zeros_like(h_state)
    hc = (h_state, c_state)
    ht = hc[0][-1]                                              # (B, H)

    lstm_out = jax.random.normal(k_x, (B, T, 2 * H), jnp.float32)
    lens = jnp.array([T, 5], dtype=jnp.int32)

    # Deterministic parameter init (shapes per nn.Module __init__)
    Wa = 0.1 * jax.random.normal(k_wa, (H, H), jnp.float32)        # Linear(H, H, bias=False)
    Ua = 0.1 * jax.random.normal(k_ua, (H, 2 * H), jnp.float32)    # Conv1d(2H, H, 1).weight squeezed
    Va = 0.1 * jax.random.normal(k_va, (H,), jnp.float32)          # Conv1d(H, 1, 1).weight squeezed
    Wdec = 0.1 * jax.random.normal(k_wd, (V, 2 * H), jnp.float32)  # Linear(2H, V).weight
    bdec = 0.01 * jax.random.normal(k_bd, (V,), jnp.float32)       # Linear(2H, V).bias

    out = intent_decoder_forward(ht, lstm_out, lens, Wa, Ua, Va, Wdec, bdec)
    out = jax.block_until_ready(out)

    ref = reference_forward(ht, lstm_out, lens, Wa, Ua, Va, Wdec, bdec)
    assert out.shape == (B, V)
    max_err = float(jnp.max(jnp.abs(out - ref)))
    # bf16 MXU operands (x, attention weights, decoder) + approx reciprocal =>
    # compare against the f32 reference with a correspondingly looser tolerance.
    assert max_err < 5e-2, f"max abs err {max_err} vs f32 reference"

    print("KERNEL_OK")
</pallas_src>

<mosaic_0001>
module attributes {stable_mosaic.version = 11 : i64} {
  func.func @intent_decoder_kernel(%arg0: i32, %arg1: memref<8x32xbf16, #tpu.memory_space<vmem>>, %arg2: memref<64x64xbf16, #tpu.memory_space<vmem>>, %arg3: memref<8x8x1xf32, #tpu.memory_space<vmem>>, %arg4: memref<32x32xbf16, #tpu.memory_space<vmem>>, %arg5: memref<64x32xbf16, #tpu.memory_space<vmem>>, %arg6: memref<1x1x32xf32, #tpu.memory_space<vmem>>, %arg7: memref<64x128xbf16, #tpu.memory_space<vmem>>, %arg8: memref<1x128xf32, #tpu.memory_space<vmem>>, %arg9: memref<8x128xf32, #tpu.memory_space<vmem>>) attributes {dimension_semantics = [#tpu.dimension_semantics<parallel>], iteration_bounds = array<i64: 1>, scalar_prefetch = 0 : i64, scratch_operands = 0 : i64, tpu.core_type = #tpu.core_type<tc>, window_params = [{transform_indices = @transform_0, window_bounds = array<i64: 8, 32>}, {transform_indices = @transform_1, window_bounds = array<i64: 64, 64>}, {transform_indices = @transform_2, window_bounds = array<i64: 8, 8, 1>}, {pipeline_mode = #tpu.pipeline_mode<synchronous>, transform_indices = @transform_3, window_bounds = array<i64: 32, 32>}, {pipeline_mode = #tpu.pipeline_mode<synchronous>, transform_indices = @transform_4, window_bounds = array<i64: 64, 32>}, {pipeline_mode = #tpu.pipeline_mode<synchronous>, transform_indices = @transform_5, window_bounds = array<i64: 1, 1, 32>}, {pipeline_mode = #tpu.pipeline_mode<synchronous>, transform_indices = @transform_6, window_bounds = array<i64: 64, 128>}, {pipeline_mode = #tpu.pipeline_mode<synchronous>, transform_indices = @transform_7, window_bounds = array<i64: 1, 128>}, {transform_indices = @transform_8, window_bounds = array<i64: 8, 128>}]} {
    %c0 = arith.constant 0 : index
    %c0_0 = arith.constant 0 : index
    %0 = vector.load %arg2[%c0, %c0_0] : memref<64x64xbf16, #tpu.memory_space<vmem>>, vector<64x64xbf16>
    %c0_1 = arith.constant 0 : index
    %c0_2 = arith.constant 0 : index
    %1 = vector.load %arg1[%c0_1, %c0_2] : memref<8x32xbf16, #tpu.memory_space<vmem>>, vector<8x32xbf16>
    %c0_3 = arith.constant 0 : index
    %c0_4 = arith.constant 0 : index
    %2 = vector.load %arg4[%c0_3, %c0_4] : memref<32x32xbf16, #tpu.memory_space<vmem>>, vector<32x32xbf16>
    %cst = arith.constant dense<0.000000e+00> : vector<8x32xf32>
    %3 = tpu.matmul %1, %2, %cst {dimension_numbers = #tpu.dot_dimension_numbers<[1], [0], [0], [1], [0, 0, 1, 1], [], []>} : vector<8x32xbf16>, vector<32x32xbf16>, vector<8x32xf32> -> vector<8x32xf32>
    %c0_5 = arith.constant 0 : index
    %c0_6 = arith.constant 0 : index
    %4 = vector.load %arg5[%c0_5, %c0_6] : memref<64x32xbf16, #tpu.memory_space<vmem>>, vector<64x32xbf16>
    %cst_7 = arith.constant dense<0.000000e+00> : vector<64x32xf32>
    %5 = tpu.matmul %0, %4, %cst_7 {dimension_numbers = #tpu.dot_dimension_numbers<[1], [0], [0], [1], [0, 0, 1, 1], [], []>} : vector<64x64xbf16>, vector<64x32xbf16>, vector<64x32xf32> -> vector<64x32xf32>
    %6 = vector.shape_cast %5 : vector<64x32xf32> to vector<8x8x32xf32>
    %7 = vector.shape_cast %3 : vector<8x32xf32> to vector<8x1x32xf32>
    %8 = vector.broadcast %7 : vector<8x1x32xf32> to vector<8x8x32xf32>
    %9 = arith.addf %6, %8 : vector<8x8x32xf32>
    %10 = math.tanh %9 : vector<8x8x32xf32>
    %c0_8 = arith.constant 0 : index
    %c0_9 = arith.constant 0 : index
    %c0_10 = arith.constant 0 : index
    %11 = vector.load %arg6[%c0_8, %c0_9, %c0_10] : memref<1x1x32xf32, #tpu.memory_space<vmem>>, vector<1x1x32xf32>
    %12 = vector.broadcast %11 : vector<1x1x32xf32> to vector<8x8x32xf32>
    %13 = arith.mulf %10, %12 : vector<8x8x32xf32>
    %cst_11 = arith.constant dense<0.000000e+00> : vector<8x8xf32>
    %14 = vector.multi_reduction <add>, %13, %cst_11 [2] : vector<8x8x32xf32> to vector<8x8xf32>
    %15 = vector.shape_cast %14 : vector<8x8xf32> to vector<8x8x1xf32>
    %c0_12 = arith.constant 0 : index
    %c0_13 = arith.constant 0 : index
    %c0_14 = arith.constant 0 : index
    %16 = vector.load %arg3[%c0_12, %c0_13, %c0_14] : memref<8x8x1xf32, #tpu.memory_space<vmem>>, vector<8x8x1xf32>
    %17 = arith.addf %15, %16 : vector<8x8x1xf32>
    %cst_15 = arith.constant dense<0xFF800000> : vector<8x1xf32>
    %18 = vector.multi_reduction <maximumf>, %17, %cst_15 [1] : vector<8x8x1xf32> to vector<8x1xf32>
    %19 = vector.shape_cast %18 : vector<8x1xf32> to vector<8x1x1xf32>
    %20 = vector.broadcast %19 : vector<8x1x1xf32> to vector<8x8x1xf32>
    %21 = arith.subf %17, %20 : vector<8x8x1xf32>
    %22 = math.exp %21 : vector<8x8x1xf32>
    %cst_16 = arith.constant dense<0.000000e+00> : vector<8x1xf32>
    %23 = vector.multi_reduction <add>, %22, %cst_16 [1] : vector<8x8x1xf32> to vector<8x1xf32>
    %24 = vector.shape_cast %23 : vector<8x1xf32> to vector<8x1x1xf32>
    %25 = tpu.reciprocal %24 {approx = true} : vector<8x1x1xf32> -> vector<8x1x1xf32>
    %26 = vector.broadcast %25 : vector<8x1x1xf32> to vector<8x8x1xf32>
    %27 = arith.mulf %22, %26 : vector<8x8x1xf32>
    %28 = vector.shape_cast %27 : vector<8x8x1xf32> to vector<64x1xf32>
    %29 = arith.truncf %28 : vector<64x1xf32> to vector<64x1xbf16>
    %30 = vector.broadcast %29 : vector<64x1xbf16> to vector<64x64xbf16>
    %31 = arith.mulf %0, %30 : vector<64x64xbf16>
    %32 = tpu.iota {dimensions = array<i32: 0>} : vector<8x64xi32>
    %33 = tpu.iota {dimensions = array<i32: 1>} : vector<8x64xi32>
    %c8_i32 = arith.constant 8 : i32
    %34 = vector.broadcast %c8_i32 : i32 to vector<8x64xi32>
    %35 = arith.muli %32, %34 : vector<8x64xi32>
    %36 = arith.cmpi sge, %33, %35 : vector<8x64xi32>
    %c8_i32_17 = arith.constant 8 : i32
    %37 = vector.broadcast %c8_i32_17 : i32 to vector<8x64xi32>
    %38 = arith.addi %35, %37 : vector<8x64xi32>
    %39 = arith.cmpi slt, %33, %38 : vector<8x64xi32>
    %40 = arith.andi %36, %39 : vector<8x64xi1>
    %cst_18 = arith.constant 1.000000e+00 : f32
    %cst_19 = arith.constant 0.000000e+00 : f32
    %41 = vector.broadcast %cst_18 : f32 to vector<8x64xf32>
    %42 = vector.broadcast %cst_19 : f32 to vector<8x64xf32>
    %43 = arith.select %40, %41, %42 : vector<8x64xi1>, vector<8x64xf32>
    %44 = arith.truncf %43 : vector<8x64xf32> to vector<8x64xbf16>
    %cst_20 = arith.constant dense<0.000000e+00> : vector<8x64xf32>
    %45 = tpu.matmul %44, %31, %cst_20 {dimension_numbers = #tpu.dot_dimension_numbers<[1], [0], [0], [1], [0, 0, 1, 1], [], []>} : vector<8x64xbf16>, vector<64x64xbf16>, vector<8x64xf32> -> vector<8x64xf32>
    %46 = arith.truncf %45 : vector<8x64xf32> to vector<8x64xbf16>
    %c0_21 = arith.constant 0 : index
    %c0_22 = arith.constant 0 : index
    %47 = vector.load %arg7[%c0_21, %c0_22] : memref<64x128xbf16, #tpu.memory_space<vmem>>, vector<64x128xbf16>
    %cst_23 = arith.constant dense<0.000000e+00> : vector<8x128xf32>
    %48 = tpu.matmul %46, %47, %cst_23 {dimension_numbers = #tpu.dot_dimension_numbers<[1], [0], [0], [1], [0, 0, 1, 1], [], []>} : vector<8x64xbf16>, vector<64x128xbf16>, vector<8x128xf32> -> vector<8x128xf32>
    %c0_24 = arith.constant 0 : index
    %c0_25 = arith.constant 0 : index
    %49 = vector.load %arg8[%c0_24, %c0_25] : memref<1x128xf32, #tpu.memory_space<vmem>>, vector<1x128xf32>
    %50 = vector.broadcast %49 : vector<1x128xf32> to vector<8x128xf32>
    %51 = arith.addf %48, %50 : vector<8x128xf32>
    %cst_26 = arith.constant dense<0xFF800000> : vector<8xf32>
    %52 = vector.multi_reduction <maximumf>, %51, %cst_26 [1] : vector<8x128xf32> to vector<8xf32>
    %53 = vector.shape_cast %52 : vector<8xf32> to vector<8x1xf32>
    %54 = vector.broadcast %53 : vector<8x1xf32> to vector<8x128xf32>
    %55 = arith.subf %51, %54 : vector<8x128xf32>
    %56 = math.exp %55 : vector<8x128xf32>
    %cst_27 = arith.constant dense<0.000000e+00> : vector<8xf32>
    %57 = vector.multi_reduction <add>, %56, %cst_27 [1] : vector<8x128xf32> to vector<8xf32>
    %58 = vector.shape_cast %57 : vector<8xf32> to vector<8x1xf32>
    %59 = math.log %58 : vector<8x1xf32>
    %60 = vector.broadcast %59 : vector<8x1xf32> to vector<8x128xf32>
    %61 = arith.subf %55, %60 : vector<8x128xf32>
    %c0_28 = arith.constant 0 : index
    %c0_29 = arith.constant 0 : index
    %62 = vector.load %arg9[%c0_28, %c0_29] : memref<8x128xf32, #tpu.memory_space<vmem>>, vector<8x128xf32>
    tpu.vector_store %arg9[%c0_28, %c0_29], %61 {strides = array<i32>} : memref<8x128xf32, #tpu.memory_space<vmem>>, vector<8x128xf32>,
    return
  }
  func.func @transform_0(%arg0: i32) -> (i32, i32) {
    %c0_i32 = arith.constant 0 : i32
    %c0_i32_0 = arith.constant 0 : i32
    return %arg0, %c0_i32 : i32, i32
  }
  func.func @transform_1(%arg0: i32) -> (i32, i32) {
    %c0_i32 = arith.constant 0 : i32
    %c0_i32_0 = arith.constant 0 : i32
    return %arg0, %c0_i32 : i32, i32
  }
  func.func @transform_2(%arg0: i32) -> (i32, i32, i32) {
    %c0_i32 = arith.constant 0 : i32
    %c0_i32_0 = arith.constant 0 : i32
    %c0_i32_1 = arith.constant 0 : i32
    return %arg0, %c0_i32, %c0_i32_0 : i32, i32, i32
  }
  func.func @transform_3(%arg0: i32) -> (i32, i32) {
    %c0_i32 = arith.constant 0 : i32
    %c0_i32_0 = arith.constant 0 : i32
    %c0_i32_1 = arith.constant 0 : i32
    return %c0_i32, %c0_i32_0 : i32, i32
  }
  func.func @transform_4(%arg0: i32) -> (i32, i32) {
    %c0_i32 = arith.constant 0 : i32
    %c0_i32_0 = arith.constant 0 : i32
    %c0_i32_1 = arith.constant 0 : i32
    return %c0_i32, %c0_i32_0 : i32, i32
  }
  func.func @transform_5(%arg0: i32) -> (i32, i32, i32) {
    %c0_i32 = arith.constant 0 : i32
    %c0_i32_0 = arith.constant 0 : i32
    %c0_i32_1 = arith.constant 0 : i32
    %c0_i32_2 = arith.constant 0 : i32
    return %c0_i32, %c0_i32_0, %c0_i32_1 : i32, i32, i32
  }
  func.func @transform_6(%arg0: i32) -> (i32, i32) {
    %c0_i32 = arith.constant 0 : i32
    %c0_i32_0 = arith.constant 0 : i32
    %c0_i32_1 = arith.constant 0 : i32
    return %c0_i32, %c0_i32_0 : i32, i32
  }
  func.func @transform_7(%arg0: i32) -> (i32, i32) {
    %c0_i32 = arith.constant 0 : i32
    %c0_i32_0 = arith.constant 0 : i32
    %c0_i32_1 = arith.constant 0 : i32
    return %c0_i32, %c0_i32_0 : i32, i32
  }
  func.func @transform_8(%arg0: i32) -> (i32, i32) {
    %c0_i32 = arith.constant 0 : i32
    %c0_i32_0 = arith.constant 0 : i32
    return %arg0, %c0_i32 : i32, i32
  }
}

</mosaic_0001>

<bundles_post_ra>
// kernel: intent_decoder_forward.1
= control target key start
LH: loop header
LB: loop body
LE: loop exit
PB: predicated region body
PF: predicated region fallthrough
CT: control target
= control target key end

     0   :  { %v985_v0 = vmov 0.0   ;;  %vm986_vm0 = vmmov 0   ;;  %vm151_vm1 = vcmask 523264   ;;  %vm55_vm2 = vcmask 261120   ;;  %s1251_s4 = inlined_call_operand.vmem [shape: bf16[64,32], index: 4, kind: input, shape index: {}]   ;;  %s1252_s3 = inlined_call_operand.vmem [shape: bf16[32,32], index: 3, kind: input, shape index: {}]   ;;  %s1253_s1 = inlined_call_operand.vmem [shape: bf16[64,64], index: 1, kind: input, shape index: {}]   ;;  %s1254_s0 = inlined_call_operand.vmem [shape: bf16[8,32], index: 0, kind: input, shape index: {}]   ;;  %s1255_s5 = inlined_call_operand.vmem [shape: f32[1,1,32], index: 5, kind: input, shape index: {}]   ;;  %s1256_s2 = inlined_call_operand.vmem [shape: f32[8,8,1], index: 2, kind: input, shape index: {}]   ;;  %s1257_s6 = inlined_call_operand.vmem [shape: bf16[64,128], index: 6, kind: input, shape index: {}]   ;;  %s1258_s7 = inlined_call_operand.vmem [shape: f32[1,128], index: 7, kind: input, shape index: {}]   ;;  %s1259_s8 = inlined_call_operand.vmem [shape: f32[8,128], index: 8, kind: output, shape index: {}]  }
   0x1   :  { %863 = vmatprep.subr.bf16.mxu0 %v985_v0  ;;  %v919_v1 = vld [vmem:[%s1251_s4 + $0x18] sm:$0xff]   ;;  %867 = vmatprep.mubr.msk.bf16.mxu0 %vm986_vm0, %v985_v0  ;;  %v920_v2 = vld [vmem:[%s1252_s3 + $0x8] sm:$0xff]   ;;  %v921_v3 = vld [vmem:[%s1251_s4 + $0x10] sm:$0xff]   ;;  %v987_v20 = vmov 1966171168   ;;  %v234_v22 = vlaneseq  ;;  %vm390_vm3 = vcmask 7168  }
   0x2   :  { %871 = vmatprep.subr.bf16.mxu1 %v919_v1  ;;  %864 = vmatpush3.bf16.msra.mxu0 %v920_v2  ;;  %v922_v4 = vld [vmem:[%s1252_s3] sm:$0xff]   ;;  %v923_v5 = vld [vmem:[%s1251_s4 + $0x8] sm:$0xff]   ;;  %v1091_v13 = vld [vmem:[%s1253_s1 + $0x10] sm:$0xf]  ;;  %v232_v21 = vunpack.c.l.s4 %v987_v20 }
   0x3   :  { %872 = vmatpush3.bf16.msra.mxu1 %v919_v1  ;;  %865 = vmatprep.subr.bf16.mxu0 %v985_v0  ;;  %v1058_v6 = vld [vmem:[%s1253_s1] sm:$0xf]  ;;  %v1063_v7 = vld [vmem:[%s1253_s1 + $0x4] sm:$0xf]  ;;  %v1079_v11 = vld [vmem:[%s1253_s1 + $0x8] sm:$0xf] }
   0x4   :  { %873 = vmatprep.subr.bf16.mxu1 %v921_v3  ;;  %v38_v8 = vld [vmem:[%s1254_s0] sm:$0xf]  ;;  %v818_v9 = vcombine.low %v1058_v6, %v1063_v7  ;;  %v1084_v12 = vld [vmem:[%s1253_s1 + $0xc] sm:$0xf]  ;;  %v1096_v14 = vld [vmem:[%s1253_s1 + $0x14] sm:$0xf]  ;;  %v233_v23 = vunpack.c.0.s8 %v232_v21 }
   0x5   :  { %v924_v10 = vld [vmem:[%s1251_s4] sm:$0xff]   ;;  %v819_v15 = vcombine.low %v1079_v11, %v1084_v12  ;;  %v820_v16 = vcombine.low %v1091_v13, %v1096_v14  ;;  %v1108_v17 = vld [vmem:[%s1253_s1 + $0x18] sm:$0xf]  ;;  %v1113_v18 = vld [vmem:[%s1253_s1 + $0x1c] sm:$0xf]  ;;  %v1121_v24 = vshrl.u32 %v234_v22, 7 }
   0x6   :  { %866 = vmatpush3.bf16.msra.mxu0 %v922_v4  ;;  %879 = vmatprep.mubr.msk.bf16.mxu1 %vm151_vm1, %v818_v9  ;;  %v821_v19 = vcombine.low %v1108_v17, %v1113_v18 }
   0x7   :  { %874 = vmatpush3.bf16.msra.mxu1 %v921_v3  ;;  %887 = vmatprep.subr.bf16.mxu0 %v985_v0  ;;  %v236_v25 = vsub.s32 %v233_v23, %v1121_v24  ;;  %v281_v41 = vsub.s32 0, %v1121_v24 }
   0x8   :  { %875 = vmatprep.subr.bf16.mxu1 %v923_v5 }
   0x9   :  { %868 = vmatmul.mubr.msk.bf16.vlgmr.msra.gmra.mxu0 %vm55_vm2, %v38_v8  ;;  %v830_v8 = vld [vmem:[%s1255_s5] ss:$0 sm:$0xff] }
   0xa   :  { %895 = vmatprep.mubr.msk.bf16.mxu0 %vm986_vm0, %v985_v0 }
   0xb   :  { %876 = vmatpush3.bf16.msra.mxu1 %v923_v5 }
   0xc   :  { %877 = vmatprep.subr.bf16.mxu1 %v924_v10 }
   0xf   :  { %878 = vmatpush3.bf16.msra.mxu1 %v924_v10 }
  0x10   :  { %899 = vmatprep.subr.bf16.mxu1 %v985_v0 }
  0x12   :  { %880 = vmatmul.mubr.msk.bf16.vlgmr.msra.gmra.mxu1 %vm151_vm1, %v819_v15 }
  0x13   :  { %883 = vmatprep.mubr.msk.bf16.mxu1 %vm151_vm1, %v820_v16 }
  0x1a   :  { %884 = vmatmul.mubr.msk.bf16.gmra.mxu1 %vm151_vm1, %v821_v19 }
  0x1b   :  { %907 = vmatprep.mubr.msk.bf16.mxu1 %vm986_vm0, %v985_v0 }
  0xc9   :  { %v93_v26 = vpop.f32.mrf.mxu0 }
  0xca   :  { %v230_v27 = vcombine.high %v93_v26, %v93_v26  ;;  %v237_v28 = vrot.slane %v93_v26, %v236_v25 }
  0xcb   :  { %v869_v29 = vpop.f32.mrf.mxu0 }
  0xcc   :  { %v244_v30 = vrot.slane %v230_v27, %v236_v25  ;;  %v245_v31 = vcombine.high %v237_v28, %v237_v28  ;;  %v253_v34 = vrot.slane %v237_v28, %v236_v25 }
  0xcd   :  { %v96_v32 = vpop.f32.mrf.mxu0 }
  0xce   :  { %v260_v33 = vrot.slane %v244_v30, %v236_v25  ;;  %v246_v36 = vcombine.high %v244_v30, %v244_v30  ;;  %v267_v37 = vrot.slane %v245_v31, %v236_v25  ;;  %v275_v40 = vcombine.high %v253_v34, %v253_v34 }
  0xcf   :  { %v870_v35 = vpop.f32.mrf.mxu0  ;;  %v282_v56 = vrot.slane %v253_v34, %v281_v41 }
  0xd0   :  { %v276_v39 = vcombine.high %v260_v33, %v260_v33  ;;  %v274_v43 = vrot.slane %v246_v36, %v236_v25  ;;  %v277_v45 = vcombine.high %v267_v37, %v267_v37  ;;  %v290_v47 = vrot.slane %v275_v40, %v281_v41 }
  0xd1   :  { %v298_v53 = vrot.slane %v260_v33, %v281_v41  ;;  %v286_v61 = vrot.slane %v267_v37, %v281_v41  ;;  %v988_v40 = vmov 0  }
  0xd2   :  { %v881_v38 = vpop.f32.mrf.mxu1  ;;  %v306_v46 = vrot.slane %v276_v39, %v281_v41  ;;  %v278_v49 = vcombine.high %v274_v43, %v274_v43  ;;  %v294_v50 = vrot.slane %v277_v45, %v281_v41  ;;  %v302_v63 = vrot.slane %v274_v43, %v281_v41  ;;  %917 = vset.pattern.permute.xlu0 %v988_v40  ;;  %v378_v43 = vld [vmem:[%s1256_s2 + $0x20] sm:$0xff] }
  0xd3   :  { %v321_v54 = vadd.f32 %v881_v38, %v290_v47  ;;  %918 = vset.pattern.permute.xlu1 %v988_v40 }
  0xd4   :  { %v198_v42 = vpop.f32.mrf.mxu1  ;;  %v310_v58 = vrot.slane %v278_v49, %v281_v41  ;;  %v380_v41 = vld [vmem:[%s1256_s2 + $0x30] sm:$0xff] }
  0xd5   :  { %v319_v2 = vadd.f32 %v282_v56, %v198_v42 }
  0xd6   :  { %v882_v44 = vpop.f32.mrf.mxu1 }
  0xd7   :  { %v322_v59 = vadd.f32 %v882_v44, %v294_v50 }
  0xd8   :  { %v201_v48 = vpop.f32.mrf.mxu1 }
  0xd9   :  { %v320_v4 = vadd.f32 %v286_v61, %v201_v48 }
  0xda   :  { %v885_v51 = vpop.f32.mrf.mxu1 }
  0xdb   :  { %v325_v52 = vadd.f32 %v885_v51, %v306_v46  ;;  %v381_v46 = vld [vmem:[%s1256_s2 + $0x38] sm:$0xff]  ;;  %v379_v51 = vld [vmem:[%s1256_s2 + $0x28] sm:$0xff] }
  0xdc   :  { %v214_v55 = vpop.f32.mrf.mxu1 }
  0xdd   :  { %933 = vtanh.f32 %v325_v52  ;;  %v323_v57 = vadd.f32 %v298_v53, %v214_v55 }
  0xde   :  { %v886_v60 = vpop.f32.mrf.mxu1 }
  0xdf   :  { %935 = vtanh.f32 %v323_v57  ;;  %v326_v62 = vadd.f32 %v886_v60, %v310_v58  ;;  %v376_v57 = vld [vmem:[%s1256_s2 + $0x10] sm:$0xff] }
  0xe0   :  { %937 = vtanh.f32 %v321_v54  ;;  %v217_v1 = vpop.f32.mrf.mxu1 }
  0xe1   :  { %939 = vtanh.f32 %v326_v62  ;;  %v324_v3 = vadd.f32 %v302_v63, %v217_v1  ;;  %v377_v1 = vld [vmem:[%s1256_s2 + $0x18] sm:$0xff] }
  0xe2   :  { %941 = vtanh.f32 %v322_v59 }
  0xe3   :  { %943 = vtanh.f32 %v324_v3 }
  0xe4   :  { %945 = vtanh.f32 %v319_v2 }
  0xe5   :  { %947 = vtanh.f32 %v320_v4 }
  0xea   :  { %v934_v5 = vpop.eup %933 }
  0xeb   :  { %v348_v9 = vmul.f32 %v934_v5, %v830_v8 }
  0xec   :  { %v936_v10 = vpop.eup %935 }
  0xed   :  { %v938_v15 = vpop.eup %937  ;;  %v368_v16 = vsel %vm55_vm2, %v348_v9, 0.0  ;;  %v346_v19 = vmul.f32 %v936_v10, %v830_v8 }
  0xee   :  { %v940_v20 = vpop.eup %939  ;;  %369 = vadd.xlane.f32.xlu0 %v368_v16  ;;  %v344_v29 = vmul.f32 %v938_v15, %v830_v8  ;;  %v374_v15 = vld [vmem:[%s1256_s2] sm:$0xff] }
  0xef   :  { %v942_v21 = vpop.eup %941  ;;  %v362_v23 = vsel %vm55_vm2, %v346_v19, 0.0  ;;  %v349_v25 = vmul.f32 %v940_v20, %v830_v8 }
  0xf0   :  { %v944_v26 = vpop.eup %943  ;;  %363 = vadd.xlane.f32.xlu1 %v362_v23  ;;  %v345_v32 = vmul.f32 %v942_v21, %v830_v8  ;;  %v356_v34 = vsel %vm55_vm2, %v344_v29, 0.0 }
  0xf1   :  { %v371_v27 = vsel %vm55_vm2, %v349_v25, 0.0  ;;  %v347_v28 = vmul.f32 %v944_v26, %v830_v8  ;;  %v946_v30 = vpop.eup %945 }
  0xf2   :  { %372 = vadd.xlane.f32.xlu0 %v371_v27  ;;  %v948_v33 = vpop.eup %947  ;;  %v342_v35 = vmul.f32 %v946_v30, %v830_v8  ;;  %v359_v36 = vsel %vm55_vm2, %v345_v32, 0.0  ;;  %v375_v27 = vld [vmem:[%s1256_s2 + $0x8] sm:$0xff] }
  0xf3   :  { %v365_v31 = vsel %vm55_vm2, %v347_v28, 0.0  ;;  %v343_v37 = vmul.f32 %v948_v33, %v830_v8 }
  0xf4   :  { %366 = vadd.xlane.f32.xlu1 %v365_v31  ;;  %v350_v38 = vsel %vm55_vm2, %v342_v35, 0.0 }
  0xf5   :  { %v353_v39 = vsel %vm55_vm2, %v343_v37, 0.0 }
  0xf6   :  { %357 = vadd.xlane.f32.xlu0 %v356_v34 }
  0xf8   :  { %360 = vadd.xlane.f32.xlu1 %v359_v36 }
  0xfa   :  { %351 = vadd.xlane.f32.xlu0 %v350_v38 }
  0xfc   :  { %354 = vadd.xlane.f32.xlu1 %v353_v39 }
 0x177   :  { %v370_v42 = vpop.xlane.xlu0 %369 }
 0x178   :  { %v388_v44 = vadd.f32 %v380_v41, %v370_v42 }
 0x179   :  { %v364_v45 = vpop.xlane.xlu1 %363 }
 0x17a   :  { %v433_v47 = vsel %vm390_vm3, %v388_v44, -inf  ;;  %v386_v48 = vadd.f32 %v378_v43, %v364_v45 }
 0x17b   :  { %v434_v49 = vrot.slane %v433_v47, 4  ;;  %v373_v50 = vpop.xlane.xlu0 %372 }
 0x17c   :  { %v419_v52 = vsel %vm390_vm3, %v386_v48, -inf  ;;  %v1150_v53 = vadd.f32 %v381_v46, %v373_v50 }
 0x17d   :  { %v435_v54 = vmax.f32 %v433_v47, %v434_v49  ;;  %v420_v55 = vrot.slane %v419_v52, 4  ;;  %v367_v56 = vpop.xlane.xlu1 %366 }
 0x17e   :  { %v440_v58 = vsel %vm390_vm3, %v1150_v53, -inf  ;;  %v1157_v59 = vadd.f32 %v379_v51, %v367_v56 }
 0x17f   :  { %v436_v60 = vrot.slane %v435_v54, 2  ;;  %v421_v61 = vmax.f32 %v419_v52, %v420_v55  ;;  %v441_v62 = vrot.slane %v440_v58, 4  ;;  %v358_v63 = vpop.xlane.xlu0 %357 }
 0x180   :  { %v426_v2 = vsel %vm390_vm3, %v1157_v59, -inf  ;;  %v1164_v3 = vadd.f32 %v376_v57, %v358_v63 }
 0x181   :  { %v437_v4 = vmax.f32 %v435_v54, %v436_v60  ;;  %v422_v5 = vrot.slane %v421_v61, 2  ;;  %v442_v8 = vmax.f32 %v440_v58, %v441_v62  ;;  %v427_v9 = vrot.slane %v426_v2, 4  ;;  %v361_v10 = vpop.xlane.xlu1 %360 }
 0x182   :  { %v405_v16 = vsel %vm390_vm3, %v1164_v3, -inf  ;;  %v385_v19 = vadd.f32 %v377_v1, %v361_v10 }
 0x183   :  { %v438_v20 = vrot.slane %v437_v4, 1  ;;  %v423_v21 = vmax.f32 %v421_v61, %v422_v5  ;;  %v443_v23 = vrot.slane %v442_v8, 2  ;;  %v428_v25 = vmax.f32 %v426_v2, %v427_v9  ;;  %v352_v26 = vpop.xlane.xlu0 %351 }
 0x184   :  { %v406_v28 = vrot.slane %v405_v16, 4  ;;  %v412_v29 = vsel %vm390_vm3, %v385_v19, -inf  ;;  %v382_v30 = vadd.f32 %v374_v15, %v352_v26 }
 0x185   :  { %v439_v31 = vmax.f32 %v437_v4, %v438_v20  ;;  %v424_v32 = vrot.slane %v423_v21, 1  ;;  %v444_v33 = vmax.f32 %v442_v8, %v443_v23  ;;  %v429_v34 = vrot.slane %v428_v25, 2  ;;  %v355_v35 = vpop.xlane.xlu1 %354 }
 0x186   :  { %v407_v36 = vmax.f32 %v405_v16, %v406_v28  ;;  %v413_v37 = vrot.slane %v412_v29, 4  ;;  %v391_v38 = vsel %vm390_vm3, %v382_v30, -inf  ;;  %v383_v39 = vadd.f32 %v375_v27, %v355_v35 }
 0x187   :  { %v453_v40 = vsub.f32 %v388_v44, %v439_v31  ;;  %v425_v41 = vmax.f32 %v423_v21, %v424_v32  ;;  %v445_v42 = vrot.slane %v444_v33, 1  ;;  %v430_v43 = vmax.f32 %v428_v25, %v429_v34 }
 0x188   :  { %v408_v45 = vrot.slane %v407_v36, 2  ;;  %v414_v46 = vmax.f32 %v412_v29, %v413_v37  ;;  %v392_v47 = vrot.slane %v391_v38, 4  ;;  %v398_v49 = vsel %vm390_vm3, %v383_v39, -inf }
 0x189   :  { %v467_v50 = vmul.f32 1.442695, %v453_v40  ;;  %v451_v51 = vsub.f32 %v386_v48, %v425_v41  ;;  %v446_v52 = vmax.f32 %v444_v33, %v445_v42  ;;  %v431_v54 = vrot.slane %v430_v43, 1 }
 0x18a   :  { %v409_v55 = vmax.f32 %v407_v36, %v408_v45  ;;  %v415_v56 = vrot.slane %v414_v46, 2  ;;  %v393_v57 = vmax.f32 %v391_v38, %v392_v47  ;;  %v399_v58 = vrot.slane %v398_v49, 4 }
 0x18b   :  { %949 = vpow2.f32 %v467_v50  ;;  %v463_v60 = vmul.f32 1.442695, %v451_v51  ;;  %v454_v44 = vsub.f32 %v1150_v53, %v446_v52  ;;  %v432_v61 = vmax.f32 %v430_v43, %v431_v54 }
 0x18c   :  { %v410_v62 = vrot.slane %v409_v55, 1  ;;  %v416_v63 = vmax.f32 %v414_v46, %v415_v56  ;;  %v394_v1 = vrot.slane %v393_v57, 2  ;;  %v400_v2 = vmax.f32 %v398_v49, %v399_v58 }
 0x18d   :  { %951 = vpow2.f32 %v463_v60  ;;  %v469_v4 = vmul.f32 1.442695, %v454_v44  ;;  %v452_v5 = vsub.f32 %v1157_v59, %v432_v61 }
 0x18e   :  { %v411_v48 = vmax.f32 %v409_v55, %v410_v62  ;;  %v417_v8 = vrot.slane %v416_v63, 1  ;;  %v395_v9 = vmax.f32 %v393_v57, %v394_v1  ;;  %v401_v10 = vrot.slane %v400_v2, 2 }
 0x18f   :  { %953 = vpow2.f32 %v469_v4  ;;  %v465_v15 = vmul.f32 1.442695, %v452_v5 }
 0x190   :  { %v449_v16 = vsub.f32 %v1164_v3, %v411_v48  ;;  %v418_v20 = vmax.f32 %v416_v63, %v417_v8  ;;  %v396_v21 = vrot.slane %v395_v9, 1  ;;  %v402_v53 = vmax.f32 %v400_v2, %v401_v10 }
 0x191   :  { %955 = vpow2.f32 %v465_v15 }
 0x192   :  { %v459_v23 = vmul.f32 1.442695, %v449_v16  ;;  %v450_v25 = vsub.f32 %v385_v19, %v418_v20  ;;  %v397_v26 = vmax.f32 %v395_v9, %v396_v21  ;;  %v403_v27 = vrot.slane %v402_v53, 1 }
 0x194   :  { %957 = vpow2.f32 %v459_v23  ;;  %v461_v28 = vmul.f32 1.442695, %v450_v25  ;;  %v447_v29 = vsub.f32 %v382_v30, %v397_v26  ;;  %v404_v59 = vmax.f32 %v402_v53, %v403_v27 }
 0x196   :  { %959 = vpow2.f32 %v461_v28  ;;  %v455_v31 = vmul.f32 1.442695, %v447_v29  ;;  %v448_v32 = vsub.f32 %v383_v39, %v404_v59 }
 0x198   :  { %v1180_v33 = vpop.eup %949  ;;  %961 = vpow2.f32 %v455_v31  ;;  %v457_v34 = vmul.f32 1.442695, %v448_v32 }
 0x199   :  { %v513_v3 = vsel %vm390_vm3, %v1180_v33, 0.0 }
 0x19a   :  { %v1184_v35 = vpop.eup %951  ;;  %v514_v36 = vrot.slane %v513_v3, 4  ;;  %963 = vpow2.f32 %v457_v34 }
 0x19b   :  { %v499_v19 = vsel %vm390_vm3, %v1184_v35, 0.0 }
 0x19c   :  { %v1188_v37 = vpop.eup %953  ;;  %v515_v30 = vadd.f32 %v514_v36, %v513_v3  ;;  %v500_v38 = vrot.slane %v499_v19, 4 }
 0x19d   :  { %v520_v39 = vsel %vm390_vm3, %v1188_v37, 0.0 }
 0x19e   :  { %v1192_v40 = vpop.eup %955  ;;  %v516_v41 = vrot.slane %v515_v30, 2  ;;  %v501_v42 = vadd.f32 %v500_v38, %v499_v19  ;;  %v521_v43 = vrot.slane %v520_v39, 4 }
 0x19f   :  { %v506_v45 = vsel %vm390_vm3, %v1192_v40, 0.0 }
 0x1a0   :  { %v517_v46 = vadd.f32 %v516_v41, %v515_v30  ;;  %v502_v47 = vrot.slane %v501_v42, 2  ;;  %v522_v49 = vadd.f32 %v521_v43, %v520_v39  ;;  %v507_v50 = vrot.slane %v506_v45, 4 }
 0x1a1   :  { %v1196_v51 = vpop.eup %957 }
 0x1a2   :  { %v503_v52 = vadd.f32 %v502_v47, %v501_v42  ;;  %v523_v54 = vrot.slane %v522_v49, 2  ;;  %v508_v55 = vadd.f32 %v507_v50, %v506_v45  ;;  %v485_v56 = vsel %vm390_vm3, %v1196_v51, 0.0 }
 0x1a3   :  { %v1200_v57 = vpop.eup %959  ;;  %v486_v58 = vrot.slane %v485_v56, 4  ;;  %v518_v60 = vrot.slane %v517_v46, 1 }
 0x1a4   :  { %v524_v44 = vadd.f32 %v523_v54, %v522_v49  ;;  %v509_v61 = vrot.slane %v508_v55, 2  ;;  %v492_v62 = vsel %vm390_vm3, %v1200_v57, 0.0  ;;  %v504_v63 = vrot.slane %v503_v52, 1 }
 0x1a5   :  { %v962_v1 = vpop.eup %961  ;;  %v487_v2 = vadd.f32 %v486_v58, %v485_v56  ;;  %v493_v4 = vrot.slane %v492_v62, 4  ;;  %v519_v5 = vadd.f32 %v518_v60, %v517_v46 }
 0x1a6   :  { %v510_v48 = vadd.f32 %v509_v61, %v508_v55  ;;  %v471_v8 = vsel %vm390_vm3, %v962_v1, 0.0  ;;  %v525_v9 = vrot.slane %v524_v44, 1  ;;  %v505_v10 = vadd.f32 %v504_v63, %v503_v52 }
 0x1a7   :  { %v964_v15 = vpop.eup %963  ;;  %v488_v16 = vrot.slane %v487_v2, 2  ;;  %v494_v20 = vadd.f32 %v493_v4, %v492_v62  ;;  %v472_v21 = vrot.slane %v471_v8, 4  ;;  %965 = vrcp.f32 %v519_v5 }
 0x1a8   :  { %v478_v53 = vsel %vm390_vm3, %v964_v15, 0.0  ;;  %v526_v23 = vadd.f32 %v525_v9, %v524_v44  ;;  %v511_v25 = vrot.slane %v510_v48, 1  ;;  %967 = vrcp.f32 %v505_v10 }
 0x1a9   :  { %v489_v26 = vadd.f32 %v488_v16, %v487_v2  ;;  %v495_v27 = vrot.slane %v494_v20, 2  ;;  %v473_v28 = vadd.f32 %v472_v21, %v471_v8  ;;  %v479_v29 = vrot.slane %v478_v53, 4 }
 0x1aa   :  { %969 = vrcp.f32 %v526_v23  ;;  %v512_v59 = vadd.f32 %v511_v25, %v510_v48  ;;  %v990_v10 = vmov 1985246804  }
 0x1ab   :  { %v496_v31 = vadd.f32 %v495_v27, %v494_v20  ;;  %v474_v32 = vrot.slane %v473_v28, 2  ;;  %v480_v34 = vadd.f32 %v479_v29, %v478_v53  ;;  %v490_v3 = vrot.slane %v489_v26, 1 }
 0x1ac   :  { %971 = vrcp.f32 %v512_v59  ;;  %v643_v27 = vmul.u32 8, %v1121_v24 }
 0x1ad   :  { %v475_v36 = vadd.f32 %v474_v32, %v473_v28  ;;  %v481_v19 = vrot.slane %v480_v34, 2  ;;  %v491_v30 = vadd.f32 %v490_v3, %v489_v26  ;;  %v497_v38 = vrot.slane %v496_v31, 1 }
 0x1af   :  { %v482_v39 = vadd.f32 %v481_v19, %v480_v34  ;;  %v498_v41 = vadd.f32 %v497_v38, %v496_v31  ;;  %973 = vrcp.f32 %v491_v30  ;;  %v476_v42 = vrot.slane %v475_v36, 1 }
 0x1b0   :  { %v642_v34 = vand.u32 127, %v234_v22  ;;  %v645_v30 = vadd.s32 8, %v643_v27 }
 0x1b1   :  { %975 = vrcp.f32 %v498_v41  ;;  %v477_v43 = vadd.f32 %v476_v42, %v475_v36  ;;  %v483_v45 = vrot.slane %v482_v39, 1 }
 0x1b2   :  { %vm644_vm4 = vcmp.ge.s32.totalorder %v642_v34, %v643_v27  ;;  %vm646_vm5 = vcmp.lt.s32.totalorder %v642_v34, %v645_v30 }
 0x1b3   :  { %v484_v46 = vadd.f32 %v483_v45, %v482_v39  ;;  %977 = vrcp.f32 %v477_v43  ;;  %vm647_vm6 = vmand %vm644_vm4, %vm646_vm5 }
 0x1b4   :  { %v966_v47 = vpop.eup %965 }
 0x1b5   :  { %v968_v49 = vpop.eup %967  ;;  %979 = vrcp.f32 %v484_v46  ;;  %v541_v52 = vmul.f32 %v966_v47, %v1180_v33  ;;  %v648_v46 = vsel %vm647_vm6, 1.0, %v985_v0 }
 0x1b6   :  { %v539_v58 = vmul.f32 %v968_v49, %v1184_v35  ;;  %v929_v35 = vld [vmem:[%s1257_s6 + $0x18] sm:$0xff]   ;;  %v649_v47 = vpack.c.bf16 %v648_v46, %v648_v46 }
 0x1b7   :  { %v970_v50 = vpop.eup %969  ;;  %900 = vmatpush3.bf16.msra.mxu1 %v929_v35 }
 0x1b8   :  { %v542_v54 = vmul.f32 %v970_v50, %v1188_v37  ;;  %901 = vmatprep.subr.bf16.mxu1 %v985_v0 }
 0x1b9   :  { %v972_v55 = vpop.eup %971 }
 0x1ba   :  { %v546_v56 = vpack.c.bf16 %v542_v54, %v541_v52  ;;  %v540_v60 = vmul.f32 %v972_v55, %v1192_v40  ;;  %v930_v40 = vld [vmem:[%s1257_s6 + $0x10] sm:$0xff]  }
 0x1bb   :  { %902 = vmatpush3.bf16.msra.mxu1 %v930_v40 }
 0x1bc   :  { %v974_v44 = vpop.eup %973  ;;  %561 = vperm.xlu0 %917, %v546_v56   ;;  %v545_v61 = vpack.c.bf16 %v540_v60, %v539_v58  ;;  %903 = vmatprep.subr.bf16.mxu1 %v985_v0 }
 0x1bd   :  { %v537_v63 = vmul.f32 %v974_v44, %v1196_v51  ;;  %v931_v51 = vld [vmem:[%s1257_s6 + $0x8] sm:$0xff]  }
 0x1be   :  { %v976_v62 = vpop.eup %975  ;;  %557 = vperm.xlu1 %918, %v545_v61  }
 0x1bf   :  { %v538_v2 = vmul.f32 %v976_v62, %v1200_v57  ;;  %904 = vmatpush3.bf16.msra.mxu1 %v931_v51  ;;  %v932_v57 = vld [vmem:[%s1257_s6] sm:$0xff]  }
 0x1c0   :  { %v978_v4 = vpop.eup %977  ;;  %905 = vmatprep.subr.bf16.mxu1 %v985_v0 }
 0x1c1   :  { %v544_v5 = vpack.c.bf16 %v538_v2, %v537_v63  ;;  %v535_v37 = vmul.f32 %v978_v4, %v962_v1  ;;  %v989_v1 = vmov 839922192  }
 0x1c2   :  { %v980_v33 = vpop.eup %979  ;;  %v568_v9 = vunpack.c.l.s4 %v989_v1 }
 0x1c3   :  { %553 = vperm.xlu1 %918, %v544_v5   ;;  %v536_v48 = vmul.f32 %v980_v33, %v964_v15  ;;  %906 = vmatpush3.bf16.msra.mxu1 %v932_v57  ;;  %v575_v15 = vunpack.c.l.s4 %v990_v10 }
 0x1c4   :  { %v569_v16 = vunpack.c.0.s8 %v568_v9 }
 0x1c5   :  { %v543_v8 = vpack.c.bf16 %v536_v48, %v535_v37  ;;  %v576_v20 = vunpack.c.0.s8 %v575_v15 }
 0x1c6   :  { %v572_v21 = vsub.s32 %v569_v16, %v1121_v24 }
 0x1c7   :  { %549 = vperm.xlu1 %918, %v543_v8   ;;  %v579_v53 = vsub.s32 %v576_v20, %v1121_v24 }
 0x237   :  { %v562_v23 = vpop.permute.xlu0 %561 }
 0x238   :  { %v615_v25 = vrot.slane %v562_v23, %v572_v21  ;;  %v622_v26 = vrot.slane %v562_v23, %v579_v53 }
 0x239   :  { %v558_v28 = vpop.permute.xlu1 %557 }
 0x23a   :  { %v637_v29 = vmul.bf16 %v615_v25, %v1108_v17  ;;  %v638_v59 = vmul.bf16 %v622_v26, %v1113_v18  ;;  %v601_v31 = vrot.slane %v558_v28, %v572_v21  ;;  %v608_v32 = vrot.slane %v558_v28, %v579_v53 }
 0x23c   :  { %v834_v3 = vcombine.low %v637_v29, %v638_v59  ;;  %v635_v36 = vmul.bf16 %v601_v31, %v1091_v13  ;;  %v636_v19 = vmul.bf16 %v608_v32, %v1096_v14 }
 0x23e   :  { %v554_v38 = vpop.permute.xlu1 %553  ;;  %888 = vmatpush3.bf16.msra.mxu0 %v834_v3  ;;  %v833_v24 = vcombine.low %v635_v36, %v636_v19 }
 0x23f   :  { %v587_v39 = vrot.slane %v554_v38, %v572_v21  ;;  %v594_v41 = vrot.slane %v554_v38, %v579_v53  ;;  %889 = vmatprep.subr.bf16.mxu0 %v985_v0 }
 0x241   :  { %v633_v17 = vmul.bf16 %v587_v39, %v1079_v11  ;;  %v634_v18 = vmul.bf16 %v594_v41, %v1084_v12 }
 0x242   :  { %v550_v22 = vpop.permute.xlu1 %549  ;;  %890 = vmatpush3.bf16.msra.mxu0 %v833_v24 }
 0x243   :  { %v573_v42 = vrot.slane %v550_v22, %v572_v21  ;;  %v580_v13 = vrot.slane %v550_v22, %v579_v53  ;;  %891 = vmatprep.subr.bf16.mxu0 %v985_v0  ;;  %v832_v14 = vcombine.low %v633_v17, %v634_v18 }
 0x245   :  { %v631_v43 = vmul.bf16 %v573_v42, %v1058_v6  ;;  %v632_v45 = vmul.bf16 %v580_v13, %v1063_v7  ;;  %v836_v6 = vld [vmem:[%s1258_s7] ss:$0 sm:$0xff] }
 0x246   :  { %892 = vmatpush3.bf16.msra.mxu0 %v832_v14 }
 0x247   :  { %893 = vmatprep.subr.bf16.mxu0 %v985_v0  ;;  %v831_v11 = vcombine.low %v631_v43, %v632_v45 }
 0x24a   :  { %894 = vmatpush3.bf16.msra.mxu0 %v831_v11 }
 0x24d   :  { %896 = vmatmul.mubr.msk.bf16.vlgmr.msra.gmra.mxu0 %vm151_vm1, %v649_v47 }
 0x30d   :  { %v711_v12 = vpop.f32.mrf.mxu0 }
 0x30e   :  { %v717_v49 = vpack.c.bf16 %v711_v12, %v711_v12 }
 0x30f   :  { %v897_v50 = vpop.f32.mrf.mxu0 }
 0x310   :  { %908 = vmatmul.mubr.msk.bf16.vlgmr.msra.gmra.mxu1 %vm151_vm1, %v717_v49 }
 0x311   :  { %v714_v52 = vpop.f32.mrf.mxu0 }
 0x313   :  { %v898_v54 = vpop.f32.mrf.mxu0 }
 0x3d0   :  { %v794_v7 = vpop.f32.mrf.mxu1 }
 0x3d1   :  { %v795_v55 = vadd.f32 %v836_v6, %v794_v7 }
 0x3d2   :  { %v909_v56 = vpop.f32.mrf.mxu1 }
 0x3d3   :  { %800 = vmax.xlane.f32.xlu1 %v795_v55 }
 0x3d4   :  { %v797_v0 = vpop.f32.mrf.mxu1 }
 0x3d6   :  { %v910_v58 = vpop.f32.mrf.mxu1 }
 0x45c   :  { %v801_v60 = vpop.xlane.xlu1 %800 }
 0x45d   :  { %v802_v44 = vsub.f32 %v795_v55, %v801_v60 }
 0x45f   :  { %v803_v61 = vmul.f32 1.442695, %v802_v44 }
 0x461   :  { %981 = vpow2.f32 %v803_v61 }
 0x46e   :  { %v982_v62 = vpop.eup %981 }
 0x46f   :  { %805 = vadd.xlane.f32.xlu0 %v982_v62 }
 0x4f8   :  { %v806_v63 = vpop.xlane.xlu0 %805 }
 0x4f9   :  { %983 = vlog2.f32 %v806_v63 }
 0x506   :  { %v984_v2 = vpop.eup %983 }
 0x507   :  { %v808_v4 = vmul.f32 0.6931472, %v984_v2 }
 0x509   :  { %v809_v5 = vsub.f32 %v802_v44, %v808_v4 }
 0x50b   :  { %810 = vst [vmem:[%s1259_s8] sm:$0xff] %v809_v5 }

</bundles_post_ra>
